<compile_context>
chip_gen: v7x
topology: tpu7x:2x2x1
jax: 0.10.0
libtpu: 0.0.40
codegen_flags: <defaults>
</compile_context>

<pallas_src>
import functools

import jax
import jax.numpy as jnp
from jax.experimental import pallas as pl
from jax.experimental.pallas import tpu as pltpu

LANE = 128
TARGET_TILE_BYTES = 2 * 1024 * 1024   # per input per pipeline buffer
NUM_SHARDS = 2                        # leading "parallel" axis -> both TCs on v7x


def _min_row_multiple(dtype):
    # Minimum sublane multiple for a legal (non-full-extent) block.
    return {4: 8, 2: 16, 1: 32}.get(jnp.dtype(dtype).itemsize, 8)


def _make_kernel(rows, block_rows, inner_steps, needs_mask):
    def kernel(gen_ref, gt_ref, out_ref, acc_ref):
        s = pl.program_id(0)   # shard (megacore "parallel" axis)
        i = pl.program_id(1)   # row-block within shard ("arbitrary" reduction axis)

        @pl.when(i == 0)
        def _():
            acc_ref[...] = jnp.zeros_like(acc_ref)

        # Cast to f32 on-register (inputs stream in their native dtype).
        d = gen_ref[...].astype(jnp.float32) - gt_ref[...].astype(jnp.float32)
        sq = d * d

        if needs_mask:
            # Mask ONLY where the block extends past the logical row count:
            # the ragged last real block and phantom (clamped) blocks.  All
            # steady-state tiles take the plain accumulate path below.
            row0 = (s * inner_steps + i) * block_rows
            is_edge = row0 + block_rows > rows

            @pl.when(jnp.logical_not(is_edge))
            def _():
                acc_ref[...] += jnp.sum(sq, axis=0, keepdims=True)

            @pl.when(is_edge)
            def _():
                # Constant iota compared against a scalar threshold (no per-vreg
                # broadcast add of row0).
                rid = jax.lax.broadcasted_iota(jnp.int32, sq.shape, 0)
                masked = jnp.where(rid < rows - row0, sq, 0.0)
                acc_ref[...] += jnp.sum(masked, axis=0, keepdims=True)
        else:
            # Lane-parallel partial sums: 128 independent f32 accumulators
            # (sublane fold only -- no cross-lane reduce in the hot loop).
            acc_ref[...] += jnp.sum(sq, axis=0, keepdims=True)

        @pl.when(i == pl.num_programs(1) - 1)
        def _():
            out_ref[...] = acc_ref[...].reshape(out_ref.shape)

    return kernel


@functools.partial(jax.jit, static_argnames=("eps", "block_rows"))
def l2_loss(gen, gt, eps=1e-8, block_rows=None):
    assert gen.shape == gt.shape, "gen / gt shapes must match"
    n_elems = gen.size

    g = gen.reshape(-1)
    t = gt.reshape(-1)

    # Handle the <128-element ragged lane tail in plain JAX (tiny, essentially
    # free); the aligned prefix streams through the kernel.
    n_main = (n_elems // LANE) * LANE
    tail_sum = jnp.float32(0.0)
    if n_main != n_elems:
        tail_d = g[n_main:].astype(jnp.float32) - t[n_main:].astype(jnp.float32)
        tail_sum = jnp.sum(tail_d * tail_d)
        g = g[:n_main]
        t = t[:n_main]

    if n_main == 0:
        # Fewer than 128 elements: no kernel needed.
        return jnp.sqrt(tail_sum / n_elems + eps)

    rows = n_main // LANE
    g = g.reshape(rows, LANE)
    t = t.reshape(rows, LANE)

    # Dtype-aware tile sizing: ~TARGET_TILE_BYTES per input per buffer.
    min_mult = max(_min_row_multiple(gen.dtype), _min_row_multiple(gt.dtype))
    widest = max(jnp.dtype(gen.dtype).itemsize, jnp.dtype(gt.dtype).itemsize)
    if block_rows is None:
        block_rows = TARGET_TILE_BYTES // (LANE * widest)
    block_rows = max(min_mult, (int(block_rows) // min_mult) * min_mult)

    # Single full-extent block for small inputs (a full-dim block is always legal).
    if rows <= block_rows:
        block_rows = rows

    total_blocks = -(-rows // block_rows)
    n_shards = min(NUM_SHARDS, total_blocks)
    inner_steps = -(-total_blocks // n_shards)
    has_phantom = n_shards * inner_steps > total_blocks
    needs_mask = n_shards * inner_steps * block_rows > rows

    if has_phantom:
        # Clamp phantom steps of the last shard onto the last real block; their
        # contribution is zeroed by the in-kernel edge mask.
        def in_map(s, i):
            return (jnp.minimum(s * inner_steps + i, total_blocks - 1), 0)
    else:
        def in_map(s, i):
            return (s * inner_steps + i, 0)

    kernel = _make_kernel(rows, block_rows, inner_steps, needs_mask)

    in_bytes = n_main * (jnp.dtype(gen.dtype).itemsize + jnp.dtype(gt.dtype).itemsize)
    cost = pl.CostEstimate(
        flops=3 * n_main,                 # sub + mul + add per element
        transcendentals=0,
        bytes_accessed=in_bytes + n_shards * LANE * 4,
    )

    partials = pl.pallas_call(
        kernel,
        out_shape=jax.ShapeDtypeStruct((n_shards, 1, LANE), jnp.float32),
        grid_spec=pltpu.PrefetchScalarGridSpec(
            num_scalar_prefetch=0,
            grid=(n_shards, inner_steps),
            in_specs=[
                pl.BlockSpec((block_rows, LANE), in_map),
                pl.BlockSpec((block_rows, LANE), in_map),
            ],
            out_specs=pl.BlockSpec((1, 1, LANE), lambda s, i: (s, 0, 0)),
            scratch_shapes=[pltpu.VMEM((1, LANE), jnp.float32)],
        ),
        compiler_params=pltpu.CompilerParams(
            dimension_semantics=("parallel", "arbitrary"),
        ),
        cost_estimate=cost,
    )(g, t)

    # Tiny scalar epilogue: combine per-shard/lane partials + lane tail, mean + sqrt.
    # Note: single-f32-per-lane accumulation loses a few ULPs for >1e9 elements;
    # acceptable for a scalar loss.
    total = jnp.sum(partials) + tail_sum
    return jnp.sqrt(total / n_elems + eps)


if __name__ == "__main__":
    key = jax.random.PRNGKey(0)
    keys = jax.random.split(key, 10)

    def ref_l2(a, b, eps=1e-8):
        a = a.astype(jnp.float32)
        b = b.astype(jnp.float32)
        return jnp.sqrt(jnp.mean((a - b) ** 2) + eps)

    # 1) canonical small NCHW case (f32, single full-extent block).
    shape = (2, 4, 16, 16)
    gen = jax.random.normal(keys[0], shape, dtype=jnp.float32)
    gt = jax.random.normal(keys[1], shape, dtype=jnp.float32)
    out = jax.block_until_ready(l2_loss(gen, gt))
    assert jnp.allclose(out, ref_l2(gen, gt), rtol=1e-5, atol=1e-6), (out, ref_l2(gen, gt))
    assert not jnp.isnan(out)

    # 2) multi-block + 2-shard + ragged last block + phantom block
    #    (force small blocks so the small test exercises the full machinery).
    shape2 = (1, 1, 20, 128)   # 2560 elems -> 20 rows -> 3 blocks of 8 rows
    gen2 = jax.random.normal(keys[2], shape2, dtype=jnp.float32)
    gt2 = jax.random.normal(keys[3], shape2, dtype=jnp.float32)
    out2 = jax.block_until_ready(l2_loss(gen2, gt2, block_rows=8))
    assert jnp.allclose(out2, ref_l2(gen2, gt2), rtol=1e-5, atol=1e-6), (out2, ref_l2(gen2, gt2))

    # 3) bf16 inputs streamed natively (cast to f32 inside the kernel).
    gen3 = gen.astype(jnp.bfloat16)
    gt3 = gt.astype(jnp.bfloat16)
    out3 = jax.block_until_ready(l2_loss(gen3, gt3))
    assert jnp.allclose(out3, ref_l2(gen3, gt3), rtol=1e-4, atol=1e-5), (out3, ref_l2(gen3, gt3))
    assert not jnp.isnan(out3)

    # 4) misaligned total size: kernel handles the aligned prefix, plain-JAX tail.
    shape4 = (2587,)           # 2560 aligned + 27-element tail
    gen4 = jax.random.normal(keys[4], shape4, dtype=jnp.float32)
    gt4 = jax.random.normal(keys[5], shape4, dtype=jnp.float32)
    out4 = jax.block_until_ready(l2_loss(gen4, gt4, block_rows=8))
    assert jnp.allclose(out4, ref_l2(gen4, gt4), rtol=1e-5, atol=1e-6), (out4, ref_l2(gen4, gt4))

    # 5) tiny input (< 128 elems): pure-JAX path.
    gen5 = jax.random.normal(keys[6], (3, 5), dtype=jnp.float32)
    gt5 = jax.random.normal(keys[7], (3, 5), dtype=jnp.float32)
    out5 = jax.block_until_ready(l2_loss(gen5, gt5))
    assert jnp.allclose(out5, ref_l2(gen5, gt5), rtol=1e-5, atol=1e-6), (out5, ref_l2(gen5, gt5))

    # 6) default tile sizing, multi-block + phantom path with big blocks.
    shape6 = (8, 3, 256, 256)  # 1.57M elems -> 12288 rows -> 3 blocks of 4096
    gen6 = jax.random.normal(keys[8], shape6, dtype=jnp.float32)
    gt6 = jax.random.normal(keys[9], shape6, dtype=jnp.float32)
    out6 = jax.block_until_ready(l2_loss(gen6, gt6))
    assert jnp.allclose(out6, ref_l2(gen6, gt6), rtol=1e-5, atol=1e-6), (out6, ref_l2(gen6, gt6))

    print("KERNEL_OK")
</pallas_src>

<mosaic_0001>
module attributes {stable_mosaic.version = 11 : i64} {
  func.func @kernel(%arg0: i32, %arg1: i32, %arg2: memref<16x128xf32, #tpu.memory_space<vmem>>, %arg3: memref<16x128xf32, #tpu.memory_space<vmem>>, %arg4: memref<1x1x128xf32, #tpu.memory_space<vmem>>, %arg5: memref<1x128xf32, #tpu.memory_space<vmem>>) attributes {dimension_semantics = [#tpu.dimension_semantics<parallel>, #tpu.dimension_semantics<arbitrary>], iteration_bounds = array<i64: 1, 1>, scalar_prefetch = 0 : i64, scratch_operands = 1 : i64, tpu.core_type = #tpu.core_type<tc>, window_params = [{transform_indices = @transform_0, window_bounds = array<i64: 16, 128>}, {transform_indices = @transform_1, window_bounds = array<i64: 16, 128>}, {transform_indices = @transform_2, window_bounds = array<i64: 1, 1, 128>}]} {
    %c0_i32 = arith.constant 0 : i32
    %0 = arith.cmpi eq, %arg1, %c0_i32 : i32
    %1 = arith.extui %0 : i1 to i32
    %c0_i32_0 = arith.constant 0 : i32
    %2 = arith.cmpi ne, %1, %c0_i32_0 : i32
    scf.if %2 {
      %cst_10 = arith.constant 0.000000e+00 : f32
      %15 = vector.broadcast %cst_10 : f32 to vector<1x128xf32>
      %c0_11 = arith.constant 0 : index
      %c0_12 = arith.constant 0 : index
      %16 = vector.load %arg5[%c0_11, %c0_12] : memref<1x128xf32, #tpu.memory_space<vmem>>, vector<1x128xf32>
      tpu.vector_store %arg5[%c0_11, %c0_12], %15 {strides = array<i32>} : memref<1x128xf32, #tpu.memory_space<vmem>>, vector<1x128xf32>,
    } else {
    }
    %c0 = arith.constant 0 : index
    %c0_1 = arith.constant 0 : index
    %3 = vector.load %arg2[%c0, %c0_1] : memref<16x128xf32, #tpu.memory_space<vmem>>, vector<16x128xf32>
    %c0_2 = arith.constant 0 : index
    %c0_3 = arith.constant 0 : index
    %4 = vector.load %arg3[%c0_2, %c0_3] : memref<16x128xf32, #tpu.memory_space<vmem>>, vector<16x128xf32>
    %5 = arith.subf %3, %4 : vector<16x128xf32>
    %6 = arith.mulf %5, %5 : vector<16x128xf32>
    %c0_4 = arith.constant 0 : index
    %c0_5 = arith.constant 0 : index
    %7 = vector.load %arg5[%c0_4, %c0_5] : memref<1x128xf32, #tpu.memory_space<vmem>>, vector<1x128xf32>
    %cst = arith.constant dense<0.000000e+00> : vector<128xf32>
    %8 = vector.multi_reduction <add>, %6, %cst [0] : vector<16x128xf32> to vector<128xf32>
    %9 = vector.shape_cast %8 : vector<128xf32> to vector<1x128xf32>
    %10 = arith.addf %7, %9 : vector<1x128xf32>
    %c0_6 = arith.constant 0 : index
    %c0_7 = arith.constant 0 : index
    %11 = vector.load %arg5[%c0_6, %c0_7] : memref<1x128xf32, #tpu.memory_space<vmem>>, vector<1x128xf32>
    tpu.vector_store %arg5[%c0_6, %c0_7], %10 {strides = array<i32>} : memref<1x128xf32, #tpu.memory_space<vmem>>, vector<1x128xf32>,
    %c0_i32_8 = arith.constant 0 : i32
    %12 = arith.cmpi eq, %arg1, %c0_i32_8 : i32
    %13 = arith.extui %12 : i1 to i32
    %c0_i32_9 = arith.constant 0 : i32
    %14 = arith.cmpi ne, %13, %c0_i32_9 : i32
    scf.if %14 {
      %c0_10 = arith.constant 0 : index
      %c0_11 = arith.constant 0 : index
      %15 = vector.load %arg5[%c0_10, %c0_11] : memref<1x128xf32, #tpu.memory_space<vmem>>, vector<1x128xf32>
      %16 = vector.shape_cast %15 : vector<1x128xf32> to vector<1x1x128xf32>
      %c0_12 = arith.constant 0 : index
      %c0_13 = arith.constant 0 : index
      %c0_14 = arith.constant 0 : index
      %17 = vector.load %arg4[%c0_12, %c0_13, %c0_14] : memref<1x1x128xf32, #tpu.memory_space<vmem>>, vector<1x1x128xf32>
      tpu.vector_store %arg4[%c0_12, %c0_13, %c0_14], %16 {strides = array<i32>} : memref<1x1x128xf32, #tpu.memory_space<vmem>>, vector<1x1x128xf32>,
    } else {
    }
    return
  }
  func.func @transform_0(%arg0: i32, %arg1: i32) -> (i32, i32) {
    %c1_i32 = arith.constant 1 : i32
    %0 = arith.muli %arg0, %c1_i32 : i32
    %1 = arith.addi %0, %arg1 : i32
    %c0_i32 = arith.constant 0 : i32
    %c0_i32_0 = arith.constant 0 : i32
    return %1, %c0_i32 : i32, i32
  }
  func.func @transform_1(%arg0: i32, %arg1: i32) -> (i32, i32) {
    %c1_i32 = arith.constant 1 : i32
    %0 = arith.muli %arg0, %c1_i32 : i32
    %1 = arith.addi %0, %arg1 : i32
    %c0_i32 = arith.constant 0 : i32
    %c0_i32_0 = arith.constant 0 : i32
    return %1, %c0_i32 : i32, i32
  }
  func.func @transform_2(%arg0: i32, %arg1: i32) -> (i32, i32, i32) {
    %c0_i32 = arith.constant 0 : i32
    %c0_i32_0 = arith.constant 0 : i32
    %c0_i32_1 = arith.constant 0 : i32
    return %arg0, %c0_i32, %c0_i32_0 : i32, i32, i32
  }
}

</mosaic_0001>

<bundles_post_ra>
// kernel: l2_loss.1
= control target key start
LH: loop header
LB: loop body
LE: loop exit
PB: predicated region body
PF: predicated region fallthrough
CT: control target
= control target key end

     0   :  { %v100_v0 = vmov 0.0   ;;  %s131_s0 = inlined_call_operand.vmem [shape: f32[16,128], index: 0, kind: input, shape index: {}]   ;;  %s132_s1 = inlined_call_operand.vmem [shape: f32[16,128], index: 1, kind: input, shape index: {}]   ;;  %s133_s2 = inlined_call_operand.vmem [shape: f32[1,1,128], index: 2, kind: output, shape index: {}]  }
   0x1   :  { %59 = vst [vmem:[#allocation2] sm:$0x1] %v100_v0  ;;  %v60_v1 = vld [vmem:[%s131_s0] sm:$0xff]  ;;  %v61_v2 = vld [vmem:[%s131_s0 + $0x8] sm:$0xff] }
   0x2   :  { %v62_v3 = vld [vmem:[%s132_s1] sm:$0xff]  ;;  %v63_v4 = vld [vmem:[%s132_s1 + $0x8] sm:$0xff] }
   0x3   :  { %v64_v5 = vsub.f32 %v60_v1, %v62_v3  ;;  %v65_v6 = vsub.f32 %v61_v2, %v63_v4 }
   0x5   :  { %v66_v7 = vmul.f32 %v64_v5, %v64_v5  ;;  %v67_v8 = vmul.f32 %v65_v6, %v65_v6 }
   0x7   :  { %v69_v9 = vadd.f32 %v67_v8, %v66_v7 }
   0x8   :  { %v68_v15 = vld [vmem:[#allocation2] sm:$0x1] }
   0x9   :  { %v70_v10 = vrot.slane %v69_v9, 4 }
   0xb   :  { %v71_v11 = vadd.f32 %v70_v10, %v69_v9 }
   0xd   :  { %v72_v12 = vrot.slane %v71_v11, 2 }
   0xf   :  { %v73_v13 = vadd.f32 %v72_v12, %v71_v11 }
  0x11   :  { %v74_v14 = vrot.slane %v73_v13, 1 }
  0x13   :  { %v75_v16 = vadd.f32 %v74_v14, %v73_v13 }
  0x15   :  { %v76_v17 = vadd.f32 %v75_v16, %v68_v15 }
  0x17   :  { %77 = vst [vmem:[#allocation2] sm:$0x1] %v76_v17 }
  0x1e   :  { %v81_v18 = vld [vmem:[#allocation2] sm:$0x1] }
  0x1f   :  { %82 = vst [vmem:[%s133_s2] sm:$0x1] %v81_v18 }

</bundles_post_ra>
